<compile_context>
chip_gen: v6e
topology: v6e:2x2x1
jax: 0.10.0
libtpu: 0.0.40
codegen_flags: <defaults>
</compile_context>

<pallas_src>
import math

import numpy as np
import jax
import jax.numpy as jnp
from jax.experimental import pallas as pl
from jax.experimental.pallas import tpu as pltpu


# ----------------------------------------------------------------------------
# Host-side precompute (mirrors BilinearInterpolator.__init__ /
# _RegridFromLatLon.__init__): searchsorted on tiny 1-D coordinate arrays.
# Returns corner weights and the four (x_l, x_u, y_l, y_u) corner indices.
# ----------------------------------------------------------------------------
def _bilinear_corners(x_coords, y_coords, x_query, y_query):
    x_coords = np.asarray(x_coords, np.float64)
    y_coords = np.asarray(y_coords, np.float64)
    x_query = np.asarray(x_query, np.float64)
    y_query = np.asarray(y_query, np.float64)

    if np.any(x_coords[1:] < x_coords[:-1]):
        raise ValueError("x_coords must be in non-decreasing order.")
    if np.any(y_coords[1:] < y_coords[:-1]):
        raise ValueError("y_coords must be in non-decreasing order.")

    x_l = np.searchsorted(x_coords, x_query, side="right") - 1
    x_u = x_l + 1
    y_l = np.searchsorted(y_coords, y_query, side="right") - 1
    y_u = y_l + 1

    x_l = np.clip(x_l, 0, x_coords.shape[0] - 2)
    x_u = np.clip(x_u, 1, x_coords.shape[0] - 1)
    y_l = np.clip(y_l, 0, y_coords.shape[0] - 2)
    y_u = np.clip(y_u, 1, y_coords.shape[0] - 1)

    x_l_w = (x_coords[x_u] - x_query) / (x_coords[x_u] - x_coords[x_l])
    x_u_w = (x_query - x_coords[x_l]) / (x_coords[x_u] - x_coords[x_l])
    y_l_w = (y_coords[y_u] - y_query) / (y_coords[y_u] - y_coords[y_l])
    y_u_w = (y_query - y_coords[y_l]) / (y_coords[y_u] - y_coords[y_l])

    weights = np.stack(
        [x_l_w * y_l_w, x_u_w * y_l_w, x_l_w * y_u_w, x_u_w * y_u_w], axis=-1
    ).astype(np.float32)
    return (weights, x_l.astype(np.int32), x_u.astype(np.int32),
            y_l.astype(np.int32), y_u.astype(np.int32))


# ----------------------------------------------------------------------------
# Pallas kernel.
#   grid = (num_query_tiles j, num_k_blocks k)     ("parallel", "arbitrary")
#   base_ref : [num_j]  i32   SMEM  (scalar prefetch: per-tile row-block base)
#   idx_ref  : [4, TN]  i32   flat corner indices (relative to row 0 of grid)
#   w_ref    : [4, TN]  f32   matching bilinear weights (0 for padded queries)
#   z_ref    : [B, TK]  f32   one row-block window of the flattened source grid
#   o_ref    : [B, TN]  f32
#   acc_ref  : [B, TN]  f32   VMEM accumulator (resident across k)
# embedding_bag(sum) is reformulated as a sparse-one-hot matmul: a [TK, TN]
# weight matrix with <=4 nonzeros/column is built with iota/compare/select
# (VPU) over only the current row window, then z @ wmat runs on the MXU.
# ----------------------------------------------------------------------------
def _regrid_kernel(base_ref, idx_ref, w_ref, z_ref, o_ref, acc_ref):
    j = pl.program_id(0)
    k = pl.program_id(1)

    @pl.when(k == 0)
    def _():
        acc_ref[...] = jnp.zeros_like(acc_ref)

    TK = z_ref.shape[1]
    TN = idx_ref.shape[1]

    # absolute flat offset of the first element of this z block
    flat0 = (base_ref[j] + k) * TK
    gid = flat0 + jax.lax.broadcasted_iota(jnp.int32, (TK, TN), 0)

    idx = idx_ref[...]
    w = w_ref[...]

    wmat = jnp.zeros((TK, TN), jnp.float32)
    for c in range(4):  # 4 bilinear corners, fully unrolled (VPU compare/select)
        wmat = wmat + jnp.where(gid == idx[c : c + 1, :], w[c : c + 1, :], 0.0)

    # gather + weighted sum over this window == dense matmul vs sparse one-hot
    acc_ref[...] += jnp.dot(z_ref[...], wmat, preferred_element_type=jnp.float32)

    @pl.when(k == pl.num_programs(1) - 1)
    def _():
        o_ref[...] = acc_ref[...]


# ----------------------------------------------------------------------------
# Module-equivalent wrapper.
# ----------------------------------------------------------------------------
class RegridFromLatLonPallas:
    """JAX/Pallas equivalent of _RegridFromLatLon (forward semantics)."""

    def __init__(self, src_lat, src_lon, lat, lon):
        lat, lon = np.broadcast_arrays(np.asarray(lat), np.asarray(lon))
        self.query_shape = lat.shape

        src_lon = np.asarray(src_lon, np.float64).ravel()
        src_lat = np.asarray(src_lat, np.float64).ravel()
        H, W = src_lat.shape[0], src_lon.shape[0]
        self.H, self.W = H, W

        # periodic wrap in longitude: append 360 for the coordinate search only
        long = np.concatenate([src_lon, [360.0]], axis=-1)
        lat_increasing = src_lat[1] > src_lat[0]
        latg = src_lat.copy()
        lat_q = lat.ravel().astype(np.float64)
        if not lat_increasing:
            lat_q = -lat_q
            latg = -latg

        wgt, x_l, x_u, y_l, y_u = _bilinear_corners(
            long, latg, x_query=lon.ravel(), y_query=lat_q
        )
        x_u = x_u % W  # fold periodic wrap: column W -> column 0 of the SAME row
        N = wgt.shape[0]
        self.N = N

        # ---- tiling choices -------------------------------------------------
        # KR source rows per K block; KR*W must be a multiple of 128 (lane dim).
        KR = max(8, 128 // math.gcd(W, 128))
        Wp = W
        if KR * W > 32768:
            # pathological (large, 128-unfriendly W): pad lon so KR can stay 8
            Wp = ((W + 127) // 128) * 128
            KR = 8
        TK = KR * Wp
        Hp = -(-H // KR) * KR
        # query tile width; 128 keeps small query sets cheap, 256 fills the
        # 256-wide MXU / halves grid steps for large query sets (v6e/v7x).
        TN = 128 if N <= 128 else 256
        Np = -(-N // TN) * TN
        num_j = Np // TN
        self.KR, self.Wp, self.TK, self.Hp = KR, Wp, TK, Hp
        self.TN, self.Np, self.num_j = TN, Np, num_j

        # ---- sort queries by lower source-lat row so each query tile only
        # touches a narrow band of source rows (windowed gather) ---------------
        perm = np.argsort(y_l, kind="stable")
        self.inv_perm = jnp.asarray(np.argsort(perm).astype(np.int32))

        yl_s, yu_s = y_l[perm], y_u[perm]
        xl_s, xu_s = x_l[perm], x_u[perm]
        w_s = wgt[perm]
        pad = Np - N
        if pad:
            yl_s = np.concatenate([yl_s, np.full(pad, yl_s[-1], yl_s.dtype)])
            yu_s = np.concatenate([yu_s, np.full(pad, yu_s[-1], yu_s.dtype)])
            xl_s = np.concatenate([xl_s, np.full(pad, xl_s[-1], xl_s.dtype)])
            xu_s = np.concatenate([xu_s, np.full(pad, xu_s[-1], xu_s.dtype)])
            w_s = np.concatenate([w_s, np.zeros((pad, 4), np.float32)])  # 0-weight

        fidx = np.stack(
            [xl_s + Wp * yl_s, xu_s + Wp * yl_s, xl_s + Wp * yu_s, xu_s + Wp * yu_s],
            axis=0,
        ).astype(np.int32)                       # [4, Np], order matches weights
        self.fidx = jnp.asarray(fidx)
        self.w4 = jnp.asarray(np.ascontiguousarray(w_s.T).astype(np.float32))

        # ---- per-tile row-block base + global number of K blocks -------------
        yl_t = yl_s.reshape(num_j, TN)
        yu_t = yu_s.reshape(num_j, TN)
        lo = yl_t.min(axis=1)
        hi = yu_t.max(axis=1)
        base = lo // KR
        needed = -(-(hi + 1 - base * KR) // KR)          # ceil div, elementwise
        num_k = int(needed.max())
        base = np.minimum(base, Hp // KR - num_k)        # keep window inside Hp
        self.num_k = num_k
        self.base_blk = jnp.asarray(base.astype(np.int32))

    def __call__(self, x):
        # x: [..., H, W] float
        x = jnp.asarray(x, jnp.float32)
        lead = x.shape[:-2]
        H, W = x.shape[-2], x.shape[-1]
        assert H == self.H and W == self.W

        B = int(np.prod(lead)) if lead else 1
        z = x.reshape(B, H, W)
        if self.Hp != H or self.Wp != W:
            # only a small alignment pad of the source rows (no wrap copy)
            z = jnp.pad(z, ((0, 0), (0, self.Hp - H), (0, self.Wp - W)))
        z = z.reshape(B, self.Hp * self.Wp)  # free reshape (contiguous)

        TK, TN = self.TK, self.TN
        # explicit VMEM budget from actual per-step buffers (+ headroom)
        est = 4 * (2 * B * TK + TK * TN + 3 * B * TN + 16 * TN) + (2 << 20)
        vmem_limit = int(min(64 * 2**20, max(24 * 2**20, 2 * est)))

        out = pl.pallas_call(
            _regrid_kernel,
            out_shape=jax.ShapeDtypeStruct((B, self.Np), jnp.float32),
            grid_spec=pltpu.PrefetchScalarGridSpec(
                num_scalar_prefetch=1,
                grid=(self.num_j, self.num_k),
                in_specs=[
                    pl.BlockSpec((4, TN), lambda j, k, base: (0, j)),
                    pl.BlockSpec((4, TN), lambda j, k, base: (0, j)),
                    # row-block window of the flattened source grid, driven by
                    # the prefetched per-tile base table
                    pl.BlockSpec((B, TK), lambda j, k, base: (0, base[j] + k)),
                ],
                out_specs=pl.BlockSpec((B, TN), lambda j, k, base: (0, j)),
                scratch_shapes=[pltpu.VMEM((B, TN), jnp.float32)],
            ),
            compiler_params=pltpu.CompilerParams(
                dimension_semantics=("parallel", "arbitrary"),
                vmem_limit_bytes=vmem_limit,
            ),
        )(self.base_blk, self.fidx, self.w4, z)

        # un-sort to the original query order (drops query padding as well)
        out = out[:, self.inv_perm]
        return out.reshape(tuple(lead) + self.query_shape)


# ----------------------------------------------------------------------------
# Demo / self-check
# ----------------------------------------------------------------------------
if __name__ == "__main__":
    # Source lat-lon grid (lat decreasing, like typical ERA5-style grids; the
    # module flips it internally).
    nlat, nlon = 16, 16
    src_lat = np.linspace(84.0, -84.0, nlat)             # decreasing
    src_lon = np.linspace(0.0, 360.0, nlon, endpoint=False)

    # Query points (broadcast to an 8x8 grid of targets)
    lat_q = np.linspace(-75.0, 75.0, 8)[:, None]          # [8, 1]
    lon_q = np.linspace(5.0, 350.0, 8)[None, :]           # [1, 8]

    regrid = RegridFromLatLonPallas(src_lat, src_lon, lat_q, lon_q)

    # Input field: [batch=2, channels=4, H=nlat, W=nlon]  (NCHW, like PyTorch)
    key = jax.random.PRNGKey(0)
    x = jax.random.normal(key, (2, 4, nlat, nlon), dtype=jnp.float32)

    out = regrid(x)
    out = jax.block_until_ready(out)

    # Reference built the way the PyTorch module does it: wrap the longitude
    # axis explicitly (stride W+1, unwrapped upper-x index), gather 4 corners,
    # weighted sum.  This exercises the wrap-fold / sort / window / kernel path
    # independently.
    latq_b, lonq_b = np.broadcast_arrays(lat_q, lon_q)
    long = np.concatenate([src_lon, [360.0]])
    latg = -src_lat                      # src lat is decreasing -> negate
    ref_w, rxl, rxu, ryl, ryu = _bilinear_corners(
        long, latg, x_query=lonq_b.ravel(), y_query=-latq_b.ravel()
    )
    stride = nlon + 1
    ref_idx = np.stack(
        [rxl + stride * ryl, rxu + stride * ryl, rxl + stride * ryu, rxu + stride * ryu],
        axis=-1,
    )
    xnp = np.asarray(x)
    xw = np.concatenate([xnp, xnp[..., 0:1]], axis=-1)    # [2, 4, H, W+1]
    zf = xw.reshape(-1, nlat * stride)
    ref = (zf[:, ref_idx] * ref_w[None]).sum(-1).reshape((2, 4) + regrid.query_shape)

    assert out.shape == (2, 4, 8, 8), out.shape
    np.testing.assert_allclose(np.asarray(out), ref, rtol=1e-5, atol=1e-5)

    print("KERNEL_OK")
</pallas_src>

<mosaic_0001>
module attributes {stable_mosaic.version = 11 : i64} {
  func.func @_regrid_kernel(%arg0: i32, %arg1: i32, %arg2: memref<1xi32, #tpu.memory_space<smem>>, %arg3: memref<4x128xi32, #tpu.memory_space<vmem>>, %arg4: memref<4x128xf32, #tpu.memory_space<vmem>>, %arg5: memref<8x128xf32, #tpu.memory_space<vmem>>, %arg6: memref<8x128xf32, #tpu.memory_space<vmem>>, %arg7: memref<8x128xf32, #tpu.memory_space<vmem>>) attributes {dimension_semantics = [#tpu.dimension_semantics<parallel>, #tpu.dimension_semantics<arbitrary>], iteration_bounds = array<i64: 1, 2>, scalar_prefetch = 1 : i64, scratch_operands = 1 : i64, tpu.core_type = #tpu.core_type<tc>, window_params = [{transform_indices = @transform_0, window_bounds = array<i64: 4, 128>}, {transform_indices = @transform_1, window_bounds = array<i64: 4, 128>}, {transform_indices = @transform_2, window_bounds = array<i64: 8, 128>}, {transform_indices = @transform_3, window_bounds = array<i64: 8, 128>}]} {
    %c0_i32 = arith.constant 0 : i32
    %0 = arith.cmpi eq, %arg1, %c0_i32 : i32
    %1 = arith.extui %0 : i1 to i32
    %c0_i32_0 = arith.constant 0 : i32
    %2 = arith.cmpi ne, %1, %c0_i32_0 : i32
    scf.if %2 {
      %cst_16 = arith.constant 0.000000e+00 : f32
      %57 = vector.broadcast %cst_16 : f32 to vector<8x128xf32>
      %c0_17 = arith.constant 0 : index
      %c0_18 = arith.constant 0 : index
      %58 = vector.load %arg7[%c0_17, %c0_18] : memref<8x128xf32, #tpu.memory_space<vmem>>, vector<8x128xf32>
      tpu.vector_store %arg7[%c0_17, %c0_18], %57 {strides = array<i32>} : memref<8x128xf32, #tpu.memory_space<vmem>>, vector<8x128xf32>,
    } else {
    }
    %3 = arith.index_cast %arg0 : i32 to index
    %4 = memref.load %arg2[%3] : memref<1xi32, #tpu.memory_space<smem>>
    %5 = arith.addi %4, %arg1 : i32
    %c128_i32 = arith.constant 128 : i32
    %6 = arith.muli %5, %c128_i32 : i32
    %7 = tpu.iota {dimensions = array<i32: 0>} : vector<128x128xi32>
    %8 = vector.broadcast %6 : i32 to vector<128x128xi32>
    %9 = arith.addi %8, %7 : vector<128x128xi32>
    %c0 = arith.constant 0 : index
    %c0_1 = arith.constant 0 : index
    %10 = vector.load %arg3[%c0, %c0_1] : memref<4x128xi32, #tpu.memory_space<vmem>>, vector<4x128xi32>
    %c0_2 = arith.constant 0 : index
    %c0_3 = arith.constant 0 : index
    %11 = vector.load %arg4[%c0_2, %c0_3] : memref<4x128xf32, #tpu.memory_space<vmem>>, vector<4x128xf32>
    %cst = arith.constant 0.000000e+00 : f32
    %12 = vector.broadcast %cst : f32 to vector<128x128xf32>
    %13 = vector.extract_strided_slice %10 {offsets = [0, 0], sizes = [1, 128], strides = [1, 1]} : vector<4x128xi32> to vector<1x128xi32>
    %14 = vector.broadcast %13 : vector<1x128xi32> to vector<128x128xi32>
    %15 = arith.cmpi eq, %9, %14 : vector<128x128xi32>
    %16 = vector.extract_strided_slice %11 {offsets = [0, 0], sizes = [1, 128], strides = [1, 1]} : vector<4x128xf32> to vector<1x128xf32>
    %cst_4 = arith.constant 0.000000e+00 : f32
    %17 = vector.shape_cast %16 : vector<1x128xf32> to vector<1x128xf32>
    %18 = vector.broadcast %17 : vector<1x128xf32> to vector<128x128xf32>
    %19 = vector.broadcast %cst_4 : f32 to vector<128x128xf32>
    %20 = arith.select %15, %18, %19 : vector<128x128xi1>, vector<128x128xf32>
    %21 = arith.addf %12, %20 : vector<128x128xf32>
    %22 = vector.extract_strided_slice %10 {offsets = [1, 0], sizes = [1, 128], strides = [1, 1]} : vector<4x128xi32> to vector<1x128xi32>
    %23 = vector.broadcast %22 : vector<1x128xi32> to vector<128x128xi32>
    %24 = arith.cmpi eq, %9, %23 : vector<128x128xi32>
    %25 = vector.extract_strided_slice %11 {offsets = [1, 0], sizes = [1, 128], strides = [1, 1]} : vector<4x128xf32> to vector<1x128xf32>
    %cst_5 = arith.constant 0.000000e+00 : f32
    %26 = vector.shape_cast %25 : vector<1x128xf32> to vector<1x128xf32>
    %27 = vector.broadcast %26 : vector<1x128xf32> to vector<128x128xf32>
    %28 = vector.broadcast %cst_5 : f32 to vector<128x128xf32>
    %29 = arith.select %24, %27, %28 : vector<128x128xi1>, vector<128x128xf32>
    %30 = arith.addf %21, %29 : vector<128x128xf32>
    %31 = vector.extract_strided_slice %10 {offsets = [2, 0], sizes = [1, 128], strides = [1, 1]} : vector<4x128xi32> to vector<1x128xi32>
    %32 = vector.broadcast %31 : vector<1x128xi32> to vector<128x128xi32>
    %33 = arith.cmpi eq, %9, %32 : vector<128x128xi32>
    %34 = vector.extract_strided_slice %11 {offsets = [2, 0], sizes = [1, 128], strides = [1, 1]} : vector<4x128xf32> to vector<1x128xf32>
    %cst_6 = arith.constant 0.000000e+00 : f32
    %35 = vector.shape_cast %34 : vector<1x128xf32> to vector<1x128xf32>
    %36 = vector.broadcast %35 : vector<1x128xf32> to vector<128x128xf32>
    %37 = vector.broadcast %cst_6 : f32 to vector<128x128xf32>
    %38 = arith.select %33, %36, %37 : vector<128x128xi1>, vector<128x128xf32>
    %39 = arith.addf %30, %38 : vector<128x128xf32>
    %40 = vector.extract_strided_slice %10 {offsets = [3, 0], sizes = [1, 128], strides = [1, 1]} : vector<4x128xi32> to vector<1x128xi32>
    %41 = vector.broadcast %40 : vector<1x128xi32> to vector<128x128xi32>
    %42 = arith.cmpi eq, %9, %41 : vector<128x128xi32>
    %43 = vector.extract_strided_slice %11 {offsets = [3, 0], sizes = [1, 128], strides = [1, 1]} : vector<4x128xf32> to vector<1x128xf32>
    %cst_7 = arith.constant 0.000000e+00 : f32
    %44 = vector.shape_cast %43 : vector<1x128xf32> to vector<1x128xf32>
    %45 = vector.broadcast %44 : vector<1x128xf32> to vector<128x128xf32>
    %46 = vector.broadcast %cst_7 : f32 to vector<128x128xf32>
    %47 = arith.select %42, %45, %46 : vector<128x128xi1>, vector<128x128xf32>
    %48 = arith.addf %39, %47 : vector<128x128xf32>
    %c0_8 = arith.constant 0 : index
    %c0_9 = arith.constant 0 : index
    %49 = vector.load %arg7[%c0_8, %c0_9] : memref<8x128xf32, #tpu.memory_space<vmem>>, vector<8x128xf32>
    %c0_10 = arith.constant 0 : index
    %c0_11 = arith.constant 0 : index
    %50 = vector.load %arg5[%c0_10, %c0_11] : memref<8x128xf32, #tpu.memory_space<vmem>>, vector<8x128xf32>
    %cst_12 = arith.constant dense<0.000000e+00> : vector<8x128xf32>
    %51 = tpu.matmul %50, %48, %cst_12 {dimension_numbers = #tpu.dot_dimension_numbers<[1], [0], [0], [1], [0, 0, 1, 1], [], []>} : vector<8x128xf32>, vector<128x128xf32>, vector<8x128xf32> -> vector<8x128xf32>
    %52 = arith.addf %49, %51 : vector<8x128xf32>
    %c0_13 = arith.constant 0 : index
    %c0_14 = arith.constant 0 : index
    %53 = vector.load %arg7[%c0_13, %c0_14] : memref<8x128xf32, #tpu.memory_space<vmem>>, vector<8x128xf32>
    tpu.vector_store %arg7[%c0_13, %c0_14], %52 {strides = array<i32>} : memref<8x128xf32, #tpu.memory_space<vmem>>, vector<8x128xf32>,
    %c1_i32 = arith.constant 1 : i32
    %54 = arith.cmpi eq, %arg1, %c1_i32 : i32
    %55 = arith.extui %54 : i1 to i32
    %c0_i32_15 = arith.constant 0 : i32
    %56 = arith.cmpi ne, %55, %c0_i32_15 : i32
    scf.if %56 {
      %c0_16 = arith.constant 0 : index
      %c0_17 = arith.constant 0 : index
      %57 = vector.load %arg7[%c0_16, %c0_17] : memref<8x128xf32, #tpu.memory_space<vmem>>, vector<8x128xf32>
      %c0_18 = arith.constant 0 : index
      %c0_19 = arith.constant 0 : index
      %58 = vector.load %arg6[%c0_18, %c0_19] : memref<8x128xf32, #tpu.memory_space<vmem>>, vector<8x128xf32>
      tpu.vector_store %arg6[%c0_18, %c0_19], %57 {strides = array<i32>} : memref<8x128xf32, #tpu.memory_space<vmem>>, vector<8x128xf32>,
    } else {
    }
    return
  }
  func.func @transform_0(%arg0: i32, %arg1: i32, %arg2: memref<1xi32, #tpu.memory_space<smem>>) -> (i32, i32) {
    %c0_i32 = arith.constant 0 : i32
    %c0_i32_0 = arith.constant 0 : i32
    return %c0_i32, %arg0 : i32, i32
  }
  func.func @transform_1(%arg0: i32, %arg1: i32, %arg2: memref<1xi32, #tpu.memory_space<smem>>) -> (i32, i32) {
    %c0_i32 = arith.constant 0 : i32
    %c0_i32_0 = arith.constant 0 : i32
    return %c0_i32, %arg0 : i32, i32
  }
  func.func @transform_2(%arg0: i32, %arg1: i32, %arg2: memref<1xi32, #tpu.memory_space<smem>>) -> (i32, i32) {
    %0 = arith.index_cast %arg0 : i32 to index
    %1 = memref.load %arg2[%0] : memref<1xi32, #tpu.memory_space<smem>>
    %2 = arith.addi %1, %arg1 : i32
    %c0_i32 = arith.constant 0 : i32
    %c0_i32_0 = arith.constant 0 : i32
    return %c0_i32, %2 : i32, i32
  }
  func.func @transform_3(%arg0: i32, %arg1: i32, %arg2: memref<1xi32, #tpu.memory_space<smem>>) -> (i32, i32) {
    %c0_i32 = arith.constant 0 : i32
    %c0_i32_0 = arith.constant 0 : i32
    return %c0_i32, %arg0 : i32, i32
  }
}

</mosaic_0001>

<bundles_post_ra>
// kernel: tpu_custom_call.1
= control target key start
LH: loop header
LB: loop body
LE: loop exit
PB: predicated region body
PF: predicated region fallthrough
CT: control target
= control target key end

     0   :  { %s1438_s0 = inlined_call_operand.<no memory space> [shape: s32[1], index: 0, kind: input, shape index: {}]   ;;  %s1439_s1 = inlined_call_operand.hbm [shape: s32[4,128], index: 1, kind: input, shape index: {}]   ;;  %s1440_s2 = inlined_call_operand.hbm [shape: f32[4,128], index: 2, kind: input, shape index: {}]   ;;  %s1441_s3 = inlined_call_operand.hbm [shape: f32[8,256], index: 3, kind: input, shape index: {}]   ;;  %s1442_s4 = inlined_call_operand.hbm [shape: f32[8,128], index: 4, kind: output, shape index: {}]  }
   0x1   :  { %9 = sst [smem:[#allocation4]] %s1438_s0 }
   0x2   :  { %10 = vsyncpa [#allocation6], 0 }
   0x3   :  { %11 = vsyncpa [#allocation9], 0 }
   0x4   :  { %12 = vsyncpa [#allocation7], 0  ;;  %s1039_s17 = smov 0   ;;  %s1041_s18 = smov 0  }
   0x5   :  { %s1043_s19 = smov 0   ;;  %s1045_s20 = smov 0  }
   0x6   :  { %s1047_s21 = smov 0   ;;  %s1049_s22 = smov 0  }
   0x7 LB: > { %s1068_s0 = sadd.s32 4294967295, %s1002_s22   ;;  %p106_p0 = scmp.ne.s32.totalorder %s986_s18, %s982_s17  ;;  %s1002_s22 = sphi %s1049_s22, %s18_s22   ;;  %s998_s21 = sphi %s1047_s21, %s1461_s21   ;;  %s994_s20 = sphi %s1045_s20, %s1460_s20   ;;  %s990_s19 = sphi %s1043_s19, %s1459_s19   ;;  %s986_s18 = sphi %s1041_s18, %s1458_s18   ;;  %s982_s17 = sphi %s1039_s17, %s1457_s17  }
   0x8   : > { %p1443_p1 = scmp.eq.s32.totalorder %s1068_s0, 0  ;;  %p681_p2 = scmp.ge.s32.totalorder %s1002_s22, 1 }
   0x9   : > { %p143_p3 = scmp.lt.s32.totalorder %s1002_s22, 3  ;;  %s1004_s25 = smov [#allocation5]  }
   0xa   : > { %p1076_p4 = por %p1443_p1, %p106_p0  ;;  %s158_s26 = sshll.u32 %s1004_s25, 4  ;;  %s159_s26 = int_to_ptr.vmem [resolvable:$true] %s158_s26 }
   0xb   : > { %p1080_p5 = pnand %p681_p2, %p143_p3  ;;  %s1005_s27 = smov [#allocation8]  }
   0xc   : > { %s1446_s23 = scalar_select %p1076_p4, 1, 0 }
   0xd   : > { %s1447_s24 = scalar_select %p1080_p5, 1, 0 }
   0xe   : > { %p764_p6 = pneg %p1080_p5  ;;  %s171_s28 = sshll.u32 %s1005_s27, 4  ;;  %s172_s28 = int_to_ptr.vmem [resolvable:$true] %s171_s28 }
   0xf   : > { %s847_s30 = scalar_lea.vmem %s159_s26, 64  ;;  %p855_p12 = scmp.lt.s32.totalorder %s159_s26, %s159_s26 }
  0x10   : > { %p1088_p7 = pnand %p764_p6, %p1443_p1  ;;  %p848_p9 = scmp.ne.s32.totalorder %s159_s26, %s847_s30 }
  0x11   : > { %p856_p13 = scmp.lt.s32.totalorder %s847_s30, %s847_s30 }
  0x12   : > { %p838_p8 = pneg %p1088_p7 }
  0x13   : > { %p857_p0 = por %p856_p13, %p855_p12 }
  0x14   : > { %p850_p10 = pnand %p848_p9, %p838_p8 }
  0x16   : > { %p851_p11 = pneg %p850_p10 }
  0x18   : > { %p858_p2 = pnand %p857_p0, %p851_p11 }
  0x1a   : > { %861 = shalt.err (!%p858_p2)
}
  0x1b   : > { %767 = dma.hbm_to_vmem [thread:$0]  (!%p1088_p7), %s1439_s1, 64, %s159_s26, [#allocation6]  }
  0x1c   : > { %s873_s7 = scalar_lea.vmem %s172_s28, 64  ;;  %p881_p9 = scmp.lt.s32.totalorder %s172_s28, %s172_s28 }
  0x1d   : > { %p874_p3 = scmp.ne.s32.totalorder %s172_s28, %s873_s7  ;;  %p882_p10 = scmp.lt.s32.totalorder %s873_s7, %s873_s7 }
  0x1f   : > { %p876_p6 = pnand %p874_p3, %p838_p8  ;;  %p883_p4 = por %p882_p10, %p881_p9 }
  0x21   : > { %p877_p1 = pneg %p876_p6 }
  0x23   : > { %p884_p5 = pnand %p883_p4, %p877_p1 }
  0x25   : > { %887 = shalt.err (!%p884_p5)
}
  0x26   : > { %770 = dma.hbm_to_vmem [thread:$0]  (!%p1088_p7), %s1440_s2, 64, %s172_s28, [#allocation9]  }
  0x27   : > { %s27_s10 = sadd.s32 1, %s998_s21  ;;  %s86_s11 = sld [smem:[#allocation4]] }
  0x28   : > { %p28_p1 = scmp.ge.s32.totalorder %s27_s10, 2  ;;  %s93_s12 = sadd.s32 1, %s990_s19 }
  0x29   : > { %p100_p4 = scmp.ne.s32.totalorder %s990_s19, %s986_s18  ;;  %p101_p5 = scmp.eq.s32.totalorder %s1002_s22, 0 }
  0x2a   : > { %s1463_s10 = smov (%p28_p1, %s27_s10), 0  ;;  %p777_p11 = scmp.lt.s32.totalorder %s1002_s22, 2 }
  0x2b   : > { %p1117_p8 = por %p101_p5, %p100_p4  ;;  %s182_s14 = sand.u32 1, %s1002_s22  }
  0x2c   : > { %s184_s15 = sand.u32 1, %s990_s19   ;;  %s183_s9 = scalar_lea.sflag [#allocation6], %s182_s14 }
  0x2d   : > { %s87_s16 = sadd.s32 %s998_s21, %s86_s11  ;;  %s89_s17 = sadd.s32 %s86_s11, %s1463_s10 }
  0x2e   : > { %s90_s25 = ssub.s32 %s87_s16, %s89_s17  ;;  %s685_s26 = sshll.u32 %s184_s15, 3 }
  0x2f   : > { %p91_p7 = scmp.eq.s32.totalorder %s90_s25, 0  ;;  %s686_s27 = sshll.u32 %s87_s16, 7 }
  0x30   : > { %s1132_s5 = scalar_lea.hbm %s1441_s3, %s686_s27  ;;  %s186_s6 = scalar_lea.vmem [#allocation10], %s685_s26 }
  0x31   : > { %s1127_s28 = scalar_select %p91_p7, %s990_s19, %s93_s12  }
  0x32   : > { %s195_s7 = sshll.u32 %s186_s6, 4  ;;  %p1138_p12 = pnand %p777_p11, %p1117_p8  ;;  %s196_s7 = int_to_ptr.vmem [resolvable:$true] %s195_s7 }
  0x33   : > { %s888_s11 = scalar_lea.hbm %s1132_s5, 128  ;;  %s893_s16 = scalar_lea.hbm %s1441_s3, 256 }
  0x34   : > { %p889_p13 = scmp.ne.s32.totalorder %s1132_s5, %s888_s11  ;;  %p890_p0 = pneg %p1138_p12 }
  0x35   : > { %p894_p6 = scmp.lt.s32.totalorder %s1132_s5, %s1441_s3  ;;  %p895_p9 = scmp.lt.s32.totalorder %s893_s16, %s888_s11 }
  0x36   : > { %p891_p2 = pnand %p890_p0, %p889_p13 }
  0x37   : > { %p896_p10 = por %p895_p9, %p894_p6 }
  0x38   : > { %p892_p3 = pneg %p891_p2 }
  0x3a   : > { %p897_p1 = pnand %p896_p10, %p892_p3 }
  0x3c   : > { %900 = shalt.err (!%p897_p1)
}
  0x3d   : > { %s901_s13 = scalar_lea.vmem %s196_s7, 128  ;;  %s1006_s14 = smov [#allocation10]  }
  0x3e   : > { %p902_p4 = scmp.ne.s32.totalorder %s196_s7, %s901_s13  ;;  %s906_s26 = sshll.u32 %s1006_s14, 4  ;;  %s907_s26 = int_to_ptr.vmem [resolvable:$false] %s906_s26 }
  0x3f   : > { %s908_s27 = scalar_lea.vmem %s907_s26, 256  ;;  %p909_p11 = scmp.lt.s32.totalorder %s196_s7, %s907_s26 }
  0x40   : > { %p904_p5 = pnand %p902_p4, %p890_p0  ;;  %p910_p7 = scmp.lt.s32.totalorder %s908_s27, %s901_s13 }
  0x42   : > { %p905_p8 = pneg %p904_p5  ;;  %p911_p13 = por %p910_p7, %p909_p11 }
  0x44   : > { %p912_p2 = pnand %p911_p13, %p905_p8 }
  0x46   : > { %915 = shalt.err (!%p912_p2)
}
  0x47   : > { %774 = dma.hbm_to_vmem [thread:$0]  (!%p1138_p12), %s1132_s5, 128, %s196_s7, %s183_s9  }
  0x48   : > { %p1451_p3 = scmp.ne.s32.totalorder %s1447_s24, 0 }
  0x49   : > { %p1452_p6 = scmp.eq.s32.totalorder (!%p1451_p3), %s1068_s0, 0 }
  0x4a   : > { %204 = sbr.rel (%p1451_p3) target bundleno = 382 (0x17e), region = 32 }
  0x4f   : > { %965 = dma.done.wait (%p1452_p6), [#allocation6], 64   ;;  %p1453_p0 = pmov %p1452_p6 }
  0x51   : > { %967 = vsyncadd (%p1453_p0), [#allocation6], 4294967232  ;;  %p1454_p9 = pmov %p1453_p0 }
  0x52   : > { %p1455_p10 = pmov %p1453_p0 }
  0x53   : > { %969 = dma.done.wait (%p1454_p9), [#allocation9], 64  }
  0x54   : > { %971 = vsyncadd (%p1455_p10), [#allocation9], 4294967232  ;;  %s214_s29 = sand.u32 1, %s1068_s0   ;;  %s216_s30 = sand.u32 1, %s986_s18  }
  0x55   : > { %s1168_s5 = sshll.u32 %s216_s30, 3  ;;  %s215_s24 = scalar_lea.sflag [#allocation6], %s214_s29 }
  0x56   : > { %s218_s6 = scalar_lea.vmem [#allocation10], %s1168_s5  ;;  %p1456_p12 = scmp.ne.s32.totalorder %s1446_s23, 0 }
  0x58   : > { %973 = dma.done.wait (%p1456_p12), %s215_s24, 128  }
  0x59   : > { %975 = vsyncadd (%p1456_p12), %s215_s24, 4294967168  ;;  %p691_p1 = scmp.ne.s32.totalorder %s994_s20, 0 }
  0x5b   : > { %241 = sbr.rel (%p691_p1) target bundleno = 98 (0x62), region = 48 }
  0x60   : > { %v1007_v0 = vmov 0.0  }
  0x61   : > { %242 = vst [vmem:[#allocation2] sm:$0xff] %v1007_v0 }
  0x62 PF: > { %s243_s7 = sld [smem:[#allocation4]]  ;;  %v246_v1 = vlaneseq  ;;  %v1008_v2 = vmov 0.0   ;;  %vm1009_vm0 = vmmov 0   ;;  %v280_v4 = vld [vmem:[#allocation5] sm:$0xf]  ;;  %p693_p4 = scmp.ne.s32.totalorder %s994_s20, 1 }
  0x63   : > { %715 = vmatprep.subr.mxu0 %v1008_v2  ;;  %747 = vmatprep.mubr.msk.f32.mxu0 %vm1009_vm0, %v1008_v2  ;;  %v281_v5 = vld [vmem:[#allocation8] sm:$0xf] }
  0x64   : > { %v1178_v3 = vshrl.u32 %v246_v1, 7 }
  0x66   : > { %v262_v6 = vadd.s32 120, %v1178_v3  ;;  %v284_v7 = vsub.s32 0, %v1178_v3  ;;  %v340_v8 = vsub.s32 1, %v1178_v3  ;;  %v396_v9 = vsub.s32 2, %v1178_v3 }
  0x67   : > { %v452_v10 = vsub.s32 3, %v1178_v3  ;;  %v261_v11 = vadd.s32 112, %v1178_v3  ;;  %v260_v12 = vadd.s32 104, %v1178_v3  ;;  %v259_v13 = vadd.s32 96, %v1178_v3 }
  0x68   : > { %s244_s23 = sadd.s32 %s994_s20, %s243_s7  ;;  %v1189_v14 = vrot.slane %v280_v4, %v284_v7  ;;  %v1191_v15 = vrot.slane %v281_v5, %v284_v7  ;;  %v1193_v16 = vrot.slane %v280_v4, %v340_v8  ;;  %v1195_v17 = vrot.slane %v281_v5, %v340_v8 }
  0x69   : > { %s692_s8 = sshll.u32 %s244_s23, 7  ;;  %v1197_v18 = vrot.slane %v280_v4, %v396_v9  ;;  %v1199_v19 = vrot.slane %v281_v5, %v396_v9  ;;  %v1201_v20 = vrot.slane %v280_v4, %v452_v10  ;;  %v1203_v21 = vrot.slane %v281_v5, %v452_v10 }
  0x6a   : > { %v1205_v22 = vstv %s692_s8  ;;  %v258_v23 = vadd.s32 88, %v1178_v3  ;;  %v257_v24 = vadd.s32 80, %v1178_v3  ;;  %v256_v25 = vadd.s32 72, %v1178_v3 }
  0x6b   : > { %v279_v26 = vadd.s32 %v1205_v22, %v262_v6  ;;  %v278_v27 = vadd.s32 %v1205_v22, %v261_v11  ;;  %v277_v28 = vadd.s32 %v1205_v22, %v260_v12  ;;  %v276_v29 = vadd.s32 %v1205_v22, %v259_v13 }
  0x6c   : > { %v1215_v30 = vadd.s32 %v1205_v22, %v258_v23  ;;  %v1218_v31 = vadd.s32 %v1205_v22, %v257_v24  ;;  %v1221_v32 = vadd.s32 %v1205_v22, %v256_v25  ;;  %v1224_v33 = vadd.s32 64, %v1178_v3 }
  0x6d   : > { %vm301_vm1 = vcmp.eq.s32.totalorder %v279_v26, %v1189_v14  ;;  %vm357_vm2 = vcmp.eq.s32.totalorder %v279_v26, %v1193_v16  ;;  %vm413_vm3 = vcmp.eq.s32.totalorder %v279_v26, %v1197_v18  ;;  %vm469_vm4 = vcmp.eq.s32.totalorder %v279_v26, %v1201_v20 }
  0x6e   : > { %v321_v34 = vsel %vm301_vm1, %v1191_v15, 0.0  ;;  %v377_v35 = vsel %vm357_vm2, %v1195_v17, 0.0  ;;  %v433_v36 = vsel %vm413_vm3, %v1199_v19, 0.0  ;;  %v489_v37 = vsel %vm469_vm4, %v1203_v21, 0.0 }
  0x6f   : > { %v393_v38 = vadd.f32 %v377_v35, %v321_v34  ;;  %vm300_vm5 = vcmp.eq.s32.totalorder %v278_v27, %v1189_v14  ;;  %vm356_vm6 = vcmp.eq.s32.totalorder %v278_v27, %v1193_v16  ;;  %vm412_vm7 = vcmp.eq.s32.totalorder %v278_v27, %v1197_v18 }
  0x70   : > { %v320_v39 = vsel %vm300_vm5, %v1191_v15, 0.0  ;;  %v376_v40 = vsel %vm356_vm6, %v1195_v17, 0.0  ;;  %v432_v41 = vsel %vm412_vm7, %v1199_v19, 0.0  ;;  %vm468_vm8 = vcmp.eq.s32.totalorder %v278_v27, %v1201_v20 }
  0x71   : > { %v449_v42 = vadd.f32 %v433_v36, %v393_v38  ;;  %v392_v43 = vadd.f32 %v376_v40, %v320_v39  ;;  %v488_v44 = vsel %vm468_vm8, %v1203_v21, 0.0  ;;  %vm299_vm9 = vcmp.eq.s32.totalorder %v277_v28, %v1189_v14 }
  0x72   : > { %v319_v45 = vsel %vm299_vm9, %v1191_v15, 0.0  ;;  %vm355_vm10 = vcmp.eq.s32.totalorder %v277_v28, %v1193_v16  ;;  %vm411_vm11 = vcmp.eq.s32.totalorder %v277_v28, %v1197_v18  ;;  %vm467_vm12 = vcmp.eq.s32.totalorder %v277_v28, %v1201_v20 }
  0x73   : > { %v505_v46 = vadd.f32 %v489_v37, %v449_v42  ;;  %v448_v47 = vadd.f32 %v432_v41, %v392_v43  ;;  %v375_v48 = vsel %vm355_vm10, %v1195_v17, 0.0  ;;  %v431_v49 = vsel %vm411_vm11, %v1199_v19, 0.0 }
  0x74   : > { %v391_v50 = vadd.f32 %v375_v48, %v319_v45  ;;  %v487_v51 = vsel %vm467_vm12, %v1203_v21, 0.0  ;;  %vm298_vm13 = vcmp.eq.s32.totalorder %v276_v29, %v1189_v14  ;;  %vm354_vm14 = vcmp.eq.s32.totalorder %v276_v29, %v1193_v16 }
  0x75   : > { %716 = vmatpush3.msra.mxu0 %v505_v46  ;;  %v504_v52 = vadd.f32 %v488_v44, %v448_v47  ;;  %v318_v53 = vsel %vm298_vm13, %v1191_v15, 0.0  ;;  %v374_v54 = vsel %vm354_vm14, %v1195_v17, 0.0  ;;  %vm410_vm15 = vcmp.eq.s32.totalorder %v276_v29, %v1197_v18 }
  0x76   : > { %717 = vmatprep.subr.mxu0 %v1008_v2  ;;  %v447_v55 = vadd.f32 %v431_v49, %v391_v50  ;;  %v390_v56 = vadd.f32 %v374_v54, %v318_v53  ;;  %v430_v57 = vsel %vm410_vm15, %v1199_v19, 0.0  ;;  %vm466_vm0 = vcmp.eq.s32.totalorder %v276_v29, %v1201_v20 }
  0x77   : > { %718 = vmatpush3.msra.mxu0 %v504_v52  ;;  %v486_v58 = vsel %vm466_vm0, %v1203_v21, 0.0  ;;  %vm297_vm1 = vcmp.eq.s32.totalorder %v1215_v30, %v1189_v14  ;;  %vm353_vm2 = vcmp.eq.s32.totalorder %v1215_v30, %v1193_v16  ;;  %vm409_vm3 = vcmp.eq.s32.totalorder %v1215_v30, %v1197_v18 }
  0x78   : > { %719 = vmatprep.subr.mxu0 %v1008_v2  ;;  %v503_v59 = vadd.f32 %v487_v51, %v447_v55  ;;  %v446_v60 = vadd.f32 %v430_v57, %v390_v56  ;;  %v317_v61 = vsel %vm297_vm1, %v1191_v15, 0.0  ;;  %v373_v62 = vsel %vm353_vm2, %v1195_v17, 0.0 }
  0x79   : > { %v389_v63 = vadd.f32 %v373_v62, %v317_v61  ;;  %v429_v0 = vsel %vm409_vm3, %v1199_v19, 0.0  ;;  %vm465_vm4 = vcmp.eq.s32.totalorder %v1215_v30, %v1201_v20  ;;  %vm296_vm5 = vcmp.eq.s32.totalorder %v1218_v31, %v1189_v14 }
  0x7a   : > { %720 = vmatpush3.msra.mxu0 %v503_v59  ;;  %v502_v1 = vadd.f32 %v486_v58, %v446_v60  ;;  %v485_v4 = vsel %vm465_vm4, %v1203_v21, 0.0  ;;  %v316_v5 = vsel %vm296_vm5, %v1191_v15, 0.0  ;;  %vm352_vm6 = vcmp.eq.s32.totalorder %v1218_v31, %v1193_v16 }
  0x7b   : > { %721 = vmatprep.subr.mxu0 %v1008_v2  ;;  %v445_v6 = vadd.f32 %v429_v0, %v389_v63  ;;  %v372_v7 = vsel %vm352_vm6, %v1195_v17, 0.0  ;;  %vm408_vm7 = vcmp.eq.s32.totalorder %v1218_v31, %v1197_v18  ;;  %vm464_vm8 = vcmp.eq.s32.totalorder %v1218_v31, %v1201_v20 }
  0x7c   : > { %722 = vmatpush3.msra.mxu0 %v502_v1  ;;  %v388_v8 = vadd.f32 %v372_v7, %v316_v5  ;;  %v428_v9 = vsel %vm408_vm7, %v1199_v19, 0.0  ;;  %v484_v10 = vsel %vm464_vm8, %v1203_v21, 0.0  ;;  %vm295_vm9 = vcmp.eq.s32.totalorder %v1221_v32, %v1189_v14 }
  0x7d   : > { %723 = vmatprep.subr.mxu0 %v1008_v2  ;;  %v501_v11 = vadd.f32 %v485_v4, %v445_v6  ;;  %v315_v12 = vsel %vm295_vm9, %v1191_v15, 0.0  ;;  %vm351_vm10 = vcmp.eq.s32.totalorder %v1221_v32, %v1193_v16  ;;  %vm407_vm11 = vcmp.eq.s32.totalorder %v1221_v32, %v1197_v18 }
  0x7e   : > { %v444_v13 = vadd.f32 %v428_v9, %v388_v8  ;;  %v371_v23 = vsel %vm351_vm10, %v1195_v17, 0.0  ;;  %v427_v24 = vsel %vm407_vm11, %v1199_v19, 0.0  ;;  %vm463_vm12 = vcmp.eq.s32.totalorder %v1221_v32, %v1201_v20 }
  0x7f   : > { %724 = vmatpush3.msra.mxu0 %v501_v11  ;;  %v387_v25 = vadd.f32 %v371_v23, %v315_v12  ;;  %v483_v26 = vsel %vm463_vm12, %v1203_v21, 0.0  ;;  %v272_v27 = vadd.s32 %v1205_v22, %v1224_v33  ;;  %v254_v28 = vadd.s32 56, %v1178_v3 }
  0x80   : > { %725 = vmatprep.subr.mxu0 %v1008_v2  ;;  %v500_v29 = vadd.f32 %v484_v10, %v444_v13  ;;  %v253_v30 = vadd.s32 48, %v1178_v3  ;;  %v252_v31 = vadd.s32 40, %v1178_v3  ;;  %v251_v34 = vadd.s32 32, %v1178_v3 }
  0x81   : > { %v443_v35 = vadd.f32 %v427_v24, %v387_v25  ;;  %vm294_vm13 = vcmp.eq.s32.totalorder %v272_v27, %v1189_v14  ;;  %vm350_vm14 = vcmp.eq.s32.totalorder %v272_v27, %v1193_v16  ;;  %vm406_vm15 = vcmp.eq.s32.totalorder %v272_v27, %v1197_v18 }
  0x82   : > { %726 = vmatpush3.msra.mxu0 %v500_v29  ;;  %v314_v32 = vsel %vm294_vm13, %v1191_v15, 0.0  ;;  %v370_v33 = vsel %vm350_vm14, %v1195_v17, 0.0  ;;  %v426_v36 = vsel %vm406_vm15, %v1199_v19, 0.0  ;;  %vm462_vm0 = vcmp.eq.s32.totalorder %v272_v27, %v1201_v20 }
  0x83   : > { %727 = vmatprep.subr.mxu0 %v1008_v2  ;;  %v499_v37 = vadd.f32 %v483_v26, %v443_v35  ;;  %v386_v38 = vadd.f32 %v370_v33, %v314_v32  ;;  %v482_v39 = vsel %vm462_vm0, %v1203_v21, 0.0  ;;  %v271_v40 = vadd.s32 %v1205_v22, %v254_v28 }
  0x84   : > { %v270_v41 = vadd.s32 %v1205_v22, %v253_v30  ;;  %v269_v42 = vadd.s32 %v1205_v22, %v252_v31  ;;  %v268_v43 = vadd.s32 %v1205_v22, %v251_v34  ;;  %v250_v44 = vadd.s32 24, %v1178_v3 }
  0x85   : > { %728 = vmatpush3.msra.mxu0 %v499_v37  ;;  %v442_v45 = vadd.f32 %v426_v36, %v386_v38  ;;  %vm293_vm1 = vcmp.eq.s32.totalorder %v271_v40, %v1189_v14  ;;  %vm349_vm2 = vcmp.eq.s32.totalorder %v271_v40, %v1193_v16  ;;  %vm405_vm3 = vcmp.eq.s32.totalorder %v271_v40, %v1197_v18 }
  0x86   : > { %729 = vmatprep.subr.mxu0 %v1008_v2  ;;  %v313_v46 = vsel %vm293_vm1, %v1191_v15, 0.0  ;;  %v369_v47 = vsel %vm349_vm2, %v1195_v17, 0.0  ;;  %v425_v48 = vsel %vm405_vm3, %v1199_v19, 0.0  ;;  %vm461_vm4 = vcmp.eq.s32.totalorder %v271_v40, %v1201_v20 }
  0x87   : > { %v498_v49 = vadd.f32 %v482_v39, %v442_v45  ;;  %v385_v50 = vadd.f32 %v369_v47, %v313_v46  ;;  %v481_v51 = vsel %vm461_vm4, %v1203_v21, 0.0  ;;  %vm292_vm5 = vcmp.eq.s32.totalorder %v270_v41, %v1189_v14 }
  0x88   : > { %v312_v52 = vsel %vm292_vm5, %v1191_v15, 0.0  ;;  %vm348_vm6 = vcmp.eq.s32.totalorder %v270_v41, %v1193_v16  ;;  %vm404_vm7 = vcmp.eq.s32.totalorder %v270_v41, %v1197_v18  ;;  %vm460_vm8 = vcmp.eq.s32.totalorder %v270_v41, %v1201_v20 }
  0x89   : > { %730 = vmatpush3.msra.mxu0 %v498_v49  ;;  %v441_v53 = vadd.f32 %v425_v48, %v385_v50  ;;  %v368_v54 = vsel %vm348_vm6, %v1195_v17, 0.0  ;;  %v424_v55 = vsel %vm404_vm7, %v1199_v19, 0.0  ;;  %v480_v56 = vsel %vm460_vm8, %v1203_v21, 0.0 }
  0x8a   : > { %731 = vmatprep.subr.mxu0 %v1008_v2  ;;  %v384_v57 = vadd.f32 %v368_v54, %v312_v52  ;;  %vm291_vm9 = vcmp.eq.s32.totalorder %v269_v42, %v1189_v14  ;;  %vm347_vm10 = vcmp.eq.s32.totalorder %v269_v42, %v1193_v16  ;;  %vm403_vm11 = vcmp.eq.s32.totalorder %v269_v42, %v1197_v18 }
  0x8b   : > { %v497_v58 = vadd.f32 %v481_v51, %v441_v53  ;;  %v311_v59 = vsel %vm291_vm9, %v1191_v15, 0.0  ;;  %v367_v60 = vsel %vm347_vm10, %v1195_v17, 0.0  ;;  %v423_v61 = vsel %vm403_vm11, %v1199_v19, 0.0 }
  0x8c   : > { %v440_v62 = vadd.f32 %v424_v55, %v384_v57  ;;  %v383_v63 = vadd.f32 %v367_v60, %v311_v59  ;;  %vm459_vm12 = vcmp.eq.s32.totalorder %v269_v42, %v1201_v20  ;;  %vm290_vm13 = vcmp.eq.s32.totalorder %v268_v43, %v1189_v14 }
  0x8d   : > { %732 = vmatpush3.msra.mxu0 %v497_v58  ;;  %v479_v0 = vsel %vm459_vm12, %v1203_v21, 0.0  ;;  %v310_v1 = vsel %vm290_vm13, %v1191_v15, 0.0  ;;  %vm346_vm14 = vcmp.eq.s32.totalorder %v268_v43, %v1193_v16  ;;  %vm402_vm15 = vcmp.eq.s32.totalorder %v268_v43, %v1197_v18 }
  0x8e   : > { %733 = vmatprep.subr.mxu0 %v1008_v2  ;;  %v496_v4 = vadd.f32 %v480_v56, %v440_v62  ;;  %v439_v5 = vadd.f32 %v423_v61, %v383_v63  ;;  %v366_v6 = vsel %vm346_vm14, %v1195_v17, 0.0  ;;  %v422_v7 = vsel %vm402_vm15, %v1199_v19, 0.0 }
  0x8f   : > { %v382_v8 = vadd.f32 %v366_v6, %v310_v1  ;;  %vm458_vm0 = vcmp.eq.s32.totalorder %v268_v43, %v1201_v20  ;;  %v267_v9 = vadd.s32 %v1205_v22, %v250_v44  ;;  %v249_v10 = vadd.s32 16, %v1178_v3 }
  0x90   : > { %734 = vmatpush3.msra.mxu0 %v496_v4  ;;  %v495_v11 = vadd.f32 %v479_v0, %v439_v5  ;;  %v478_v12 = vsel %vm458_vm0, %v1203_v21, 0.0  ;;  %v248_v13 = vadd.s32 8, %v1178_v3  ;;  %v264_v23 = vadd.s32 %v1205_v22, %v1178_v3 }
  0x91   : > { %735 = vmatprep.subr.mxu0 %v1008_v2  ;;  %v438_v24 = vadd.f32 %v422_v7, %v382_v8  ;;  %vm289_vm1 = vcmp.eq.s32.totalorder %v267_v9, %v1189_v14  ;;  %vm345_vm2 = vcmp.eq.s32.totalorder %v267_v9, %v1193_v16  ;;  %vm401_vm3 = vcmp.eq.s32.totalorder %v267_v9, %v1197_v18 }
  0x92   : > { %736 = vmatpush3.msra.mxu0 %v495_v11  ;;  %v309_v25 = vsel %vm289_vm1, %v1191_v15, 0.0  ;;  %v365_v26 = vsel %vm345_vm2, %v1195_v17, 0.0  ;;  %v421_v27 = vsel %vm401_vm3, %v1199_v19, 0.0  ;;  %vm457_vm4 = vcmp.eq.s32.totalorder %v267_v9, %v1201_v20 }
  0x93   : > { %737 = vmatprep.subr.mxu0 %v1008_v2  ;;  %v494_v3 = vadd.f32 %v478_v12, %v438_v24  ;;  %v381_v28 = vadd.f32 %v365_v26, %v309_v25  ;;  %v477_v29 = vsel %vm457_vm4, %v1203_v21, 0.0  ;;  %v266_v30 = vadd.s32 %v1205_v22, %v249_v10 }
  0x94   : > { %v265_v31 = vadd.s32 %v1205_v22, %v248_v13  ;;  %vm286_vm5 = vcmp.eq.s32.totalorder %v264_v23, %v1189_v14  ;;  %vm342_vm6 = vcmp.eq.s32.totalorder %v264_v23, %v1193_v16  ;;  %vm398_vm7 = vcmp.eq.s32.totalorder %v264_v23, %v1197_v18 }
  0x95   : > { %738 = vmatpush3.msra.mxu0 %v494_v3  ;;  %v437_v34 = vadd.f32 %v421_v27, %v381_v28  ;;  %vm288_vm8 = vcmp.eq.s32.totalorder %v266_v30, %v1189_v14  ;;  %vm344_vm9 = vcmp.eq.s32.totalorder %v266_v30, %v1193_v16  ;;  %vm400_vm10 = vcmp.eq.s32.totalorder %v266_v30, %v1197_v18 }
  0x96   : > { %739 = vmatprep.subr.mxu0 %v1008_v2  ;;  %v308_v35 = vsel %vm288_vm8, %v1191_v15, 0.0  ;;  %v364_v22 = vsel %vm344_vm9, %v1195_v17, 0.0  ;;  %v420_v32 = vsel %vm400_vm10, %v1199_v19, 0.0  ;;  %vm456_vm11 = vcmp.eq.s32.totalorder %v266_v30, %v1201_v20 }
  0x97   : > { %v493_v33 = vadd.f32 %v477_v29, %v437_v34  ;;  %v380_v36 = vadd.f32 %v364_v22, %v308_v35  ;;  %v476_v37 = vsel %vm456_vm11, %v1203_v21, 0.0  ;;  %vm287_vm12 = vcmp.eq.s32.totalorder %v265_v31, %v1189_v14 }
  0x98   : > { %v307_v38 = vsel %vm287_vm12, %v1191_v15, 0.0  ;;  %vm343_vm13 = vcmp.eq.s32.totalorder %v265_v31, %v1193_v16  ;;  %vm399_vm14 = vcmp.eq.s32.totalorder %v265_v31, %v1197_v18  ;;  %vm455_vm15 = vcmp.eq.s32.totalorder %v265_v31, %v1201_v20  ;;  %v506_v18 = vld [vmem:[#allocation2] sm:$0xff] }
  0x99   : > { %740 = vmatpush3.msra.mxu0 %v493_v33  ;;  %v436_v39 = vadd.f32 %v420_v32, %v380_v36  ;;  %v363_v40 = vsel %vm343_vm13, %v1195_v17, 0.0  ;;  %v419_v41 = vsel %vm399_vm14, %v1199_v19, 0.0  ;;  %v306_v43 = vsel %vm286_vm5, %v1191_v15, 0.0 }
  0x9a   : > { %741 = vmatprep.subr.mxu0 %v1008_v2  ;;  %v379_v42 = vadd.f32 %v363_v40, %v307_v38  ;;  %v362_v44 = vsel %vm342_vm6, %v1195_v17, 0.0  ;;  %v418_v45 = vsel %vm398_vm7, %v1199_v19, 0.0  ;;  %v475_v47 = vsel %vm455_vm15, %v1203_v21, 0.0  ;;  %v507_v17 = vld [vmem:[%s218_s6] sm:$0xff] }
  0x9b   : > { %v492_v46 = vadd.f32 %v476_v37, %v436_v39  ;;  %v378_v48 = vadd.f32 %v362_v44, %v306_v43  ;;  %vm454_vm0 = vcmp.eq.s32.totalorder %v264_v23, %v1201_v20 }
  0x9c   : > { %v435_v49 = vadd.f32 %v419_v41, %v379_v42  ;;  %v474_v50 = vsel %vm454_vm0, %v1203_v21, 0.0 }
  0x9d   : > { %742 = vmatpush3.msra.mxu0 %v492_v46  ;;  %v434_v14 = vadd.f32 %v418_v45, %v378_v48 }
  0x9e   : > { %743 = vmatprep.subr.mxu0 %v1008_v2  ;;  %v491_v15 = vadd.f32 %v475_v47, %v435_v49 }
  0x9f   : > { %v490_v16 = vadd.f32 %v474_v50, %v434_v14 }
  0xa0   : > { %744 = vmatpush3.msra.mxu0 %v491_v15 }
  0xa1   : > { %745 = vmatprep.subr.mxu0 %v1008_v2 }
  0xa2   : > { %746 = vmatpush3.msra.mxu0 %v490_v16 }
  0xa3   : > { %748 = vmatmul.mubr.f32.vlgmr.msra.gmra.mxu0 %v507_v17 }
 0x162   : > { %583 = sbr.rel (%p693_p4) target bundleno = 367 (0x16f), region = 52 }
 0x163   : > { %v574_v19 = vpop.f32.mrf.mxu0 }
 0x164   : > { %v578_v51 = vadd.f32 %v574_v19, %v506_v18 }
 0x165   : > { %v749_v20 = vpop.f32.mrf.mxu0 }
 0x166   : > { %579 = vst [vmem:[#allocation2] sm:$0xff] %v578_v51 }
 0x16d   : > { %v584_v21 = vld [vmem:[#allocation2] sm:$0xff] }
 0x16e   : > { %585 = vst [vmem:[#allocation11] sm:$0xff] %v584_v21 }
 0x16f PF: > { %p780_p5 = scmp.eq.s32.totalorder %s1068_s0, 1  ;;  %s1010_s9 = smov [#allocation11]  }
 0x170   : > { %s595_s11 = sshll.u32 %s1010_s9, 4  ;;  %s596_s11 = int_to_ptr.vmem [resolvable:$true] %s595_s11 }
 0x171   : > { %s916_s12 = scalar_lea.vmem %s596_s11, 128  ;;  %p923_p13 = scmp.lt.s32.totalorder %s596_s11, %s596_s11 }
 0x172   : > { %p917_p8 = scmp.ne.s32.totalorder %s596_s11, %s916_s12  ;;  %p924_p2 = scmp.lt.s32.totalorder %s916_s12, %s916_s12 }
 0x174   : > { %p918_p11 = pnand %p917_p8, %p780_p5  ;;  %p925_p3 = por %p924_p2, %p923_p13 }
 0x176   : > { %p919_p7 = pneg %p918_p11 }
 0x178   : > { %p926_p6 = pnand %p925_p3, %p919_p7 }
 0x17a   : > { %929 = shalt.err (!%p926_p6)
}
 0x17b   : > { %761 = dma.vmem_to_hbm [thread:$0]  (%p780_p5), %s596_s11, 128, %s1442_s4, [#allocation7]  }
 0x17c   : > { %977 = dma.done.wait (%p780_p5), [#allocation7], 128  }
 0x17d   : > { %979 = vsyncadd (%p780_p5), [#allocation7], 4294967168 }
 0x17e PF: > { %s18_s22 = sadd.s32 1, %s1002_s22   ;;  %s1457_s17 = smov %s986_s18 }
 0x17f   : > { %p15_p0 = scmp.ge.s32.totalorder %s18_s22, 4   ;;  %s1458_s18 = smov %s990_s19 }
 0x180   : > { %s1459_s19 = smov %s1127_s28  ;;  %s1460_s20 = smov %s998_s21 }
 0x181   : > { %s1461_s21 = smov %s1463_s10  ;;  %17 = sbr.rel (!%p15_p0) target bundleno = 7 (0x7), region = 87 }
 0x186   :  { %608 = vsyncpa [#allocation6], 1 }
 0x187   :  { %610 = vsyncpa [#allocation6 + $0x1], 1 }
 0x188   :  { %611 = vsyncpa [#allocation9], 1 }
 0x189   :  { %612 = vsyncpa [#allocation7], 1 }
 0x18a   :  { %614 = vsyncpa [#allocation7 + $0x1], 1 }

</bundles_post_ra>
